<compile_context>
chip_gen: v5e
topology: v5e:2x2
jax: 0.10.0
libtpu: 0.0.40
codegen_flags: <defaults>
</compile_context>

<pallas_src>
import functools

import jax
import jax.numpy as jnp
from jax.experimental import pallas as pl
from jax.experimental.pallas import tpu as pltpu

# Largest batch rows per grid step (multiple of 128 so the transposed,
# lane-dense output block stays aligned).  At d_in ~ O(100) a 2048-row f32
# x-tile is < 1 MiB, far below VMEM limits even double-buffered.
_MAX_BATCH_TILE = 2048
# Up to this many rows we use a single full-batch block (block == full array
# dim => no (8,128) constraint, no padding).  Above it we keep >= 2 tiles so
# both v7x TensorCores get work.
_SINGLE_BLOCK_MAX = 1024


def _round_up(x, m):
    return ((x + m - 1) // m) * m


def _choose_batch_tiling(batch):
    """Returns (tile_rows, padded_batch, num_tiles)."""
    if batch <= _SINGLE_BLOCK_MAX:
        return batch, batch, 1
    num_tiles = max(2, -(-batch // _MAX_BATCH_TILE))
    tb = _round_up(-(-batch // num_tiles), 128)   # bounded waste: <128 rows/tile
    return tb, num_tiles * tb, num_tiles


def _fused_mlp_kernel(*refs, num_hidden_layers):
    """refs = (x, W0, b0, ..., W_{L-2}, b_{L-2}, Wlast_T, blast_col, out_T)."""
    x_ref = refs[0]
    o_ref = refs[-1]
    wb = refs[1:-1]

    h = x_ref[...].astype(jnp.float32)
    # Python loop -> fully unrolled at trace time; h stays register/VMEM
    # resident between layers, tanh runs on the live value (EUP slot).
    for layer in range(num_hidden_layers):
        w = wb[2 * layer][...]                 # (d_in_l, d_out_l)
        b = wb[2 * layer + 1][...]             # (1, d_out_l) -> broadcast add
        h = jnp.tanh(jnp.dot(h, w, preferred_element_type=jnp.float32) + b)

    # Last layer computed transposed so the stored tile is lane-dense
    # (batch on the lane axis):  out_T = Wlast_T (contract k) h  + b.
    w_t = wb[2 * num_hidden_layers][...]        # (d_out, d_last_in)
    b_c = wb[2 * num_hidden_layers + 1][...]    # (d_out, 1)
    out_t = jax.lax.dot_general(
        w_t, h, (((1,), (1,)), ((), ())),
        preferred_element_type=jnp.float32) + b_c
    o_ref[...] = out_t.astype(o_ref.dtype)


def _fused_mlp_pallas(x, params):
    """Run the whole MLP in one pallas_call. params: list of (W(in,out), b(out,))."""
    batch, d_in = x.shape
    num_layers = len(params)
    d_out = params[-1][0].shape[1]

    tb, padded_batch, num_tiles = _choose_batch_tiling(batch)
    # Minimal padding only (never a whole extra tile); zero for the
    # single-block path and for batches that divide evenly.
    x_p = x if padded_batch == batch else jnp.pad(
        x, ((0, padded_batch - batch), (0, 0)))

    in_specs = [pl.BlockSpec((tb, d_in), lambda i: (i, 0))]
    args = [x_p]
    # Hidden layers: W stored (in, out) so each layer is h @ W + b on the MXU.
    for (w, b) in params[:-1]:
        di, do = w.shape
        # Constant block index => fetched once, stays VMEM-resident.
        in_specs.append(pl.BlockSpec((di, do), lambda i: (0, 0)))
        in_specs.append(pl.BlockSpec((1, do), lambda i: (0, 0)))
        args.append(w)
        args.append(b.reshape(1, do))
    # Last layer passed transposed: (d_out, d_last_in) weight, (d_out, 1) bias.
    w_last, b_last = params[-1]
    d_last_in = w_last.shape[0]
    in_specs.append(pl.BlockSpec((d_out, d_last_in), lambda i: (0, 0)))
    in_specs.append(pl.BlockSpec((d_out, 1), lambda i: (0, 0)))
    args.append(w_last.T)
    args.append(b_last.reshape(d_out, 1))

    # VMEM budget: x/out double-buffered + resident weights + activation slack.
    f32b = 4
    weight_bytes = sum(w.size + b.size for (w, b) in params) * f32b
    max_width = max([d_in] + [w.shape[1] for (w, _) in params])
    footprint = (2 * tb * d_in * f32b + 2 * d_out * tb * f32b
                 + 2 * weight_bytes + 4 * tb * max_width * f32b)
    vmem_limit = int(min(64 * 1024 * 1024,
                         max(2 * footprint, 32 * 1024 * 1024)))

    kernel = functools.partial(
        _fused_mlp_kernel, num_hidden_layers=num_layers - 1)
    out_t = pl.pallas_call(
        kernel,
        out_shape=jax.ShapeDtypeStruct((d_out, padded_batch), jnp.float32),
        grid_spec=pltpu.PrefetchScalarGridSpec(
            num_scalar_prefetch=0,
            grid=(num_tiles,),
            in_specs=in_specs,
            # Lane-dense output: batch on the lane axis (tile multiple of 128
            # whenever num_tiles > 1, full dim otherwise).
            out_specs=pl.BlockSpec((d_out, tb), lambda i: (0, i)),
        ),
        compiler_params=pltpu.CompilerParams(
            # Independent batch tiles: shard across TensorCores on v7x
            # megacore; no-op on single-TC v5e/v6e.
            dimension_semantics=("parallel",),
            vmem_limit_bytes=vmem_limit),
    )(*args)
    # (d_out, padded_batch) -> (batch, d_out); a cheap reshape when d_out == 1.
    return out_t[:, :batch].T


class CriticPallas:
    """JAX/Pallas re-implementation of FJSP-DRL Critic (MLP with tanh)."""

    def __init__(self, num_layers, input_dim, hidden_dim, output_dim, key):
        if num_layers < 1:
            raise ValueError("number of layers should be positive!")
        self.num_layers = num_layers
        self.linear_or_not = num_layers == 1

        dims = ([(input_dim, output_dim)] if num_layers == 1 else
                [(input_dim, hidden_dim)]
                + [(hidden_dim, hidden_dim)] * (num_layers - 2)
                + [(hidden_dim, output_dim)])

        # Deterministic init matching nn.Linear default:
        # W, b ~ U(-1/sqrt(fan_in), 1/sqrt(fan_in)).
        self.params = []
        for (fan_in, fan_out) in dims:
            key, kw, kb = jax.random.split(key, 3)
            bound = 1.0 / jnp.sqrt(jnp.float32(fan_in))
            # PyTorch stores (out, in); we store transposed (in, out) so the
            # kernel computes x @ W directly (same math as x @ W_pt^T).
            w = jax.random.uniform(kw, (fan_in, fan_out), jnp.float32,
                                   minval=-bound, maxval=bound)
            b = jax.random.uniform(kb, (fan_out,), jnp.float32,
                                   minval=-bound, maxval=bound)
            self.params.append((w, b))

    def __call__(self, x):
        # Single fused pallas_call covers both the linear (num_layers==1) and
        # the general MLP case: tanh on all but the last layer.
        return _fused_mlp_pallas(x, self.params)


def _reference_forward(critic, x):
    """Pure-JAX reference for correctness check."""
    if critic.linear_or_not:
        w, b = critic.params[0]
        return x @ w + b
    h = x
    for layer in range(critic.num_layers - 1):
        w, b = critic.params[layer]
        h = jnp.tanh(h @ w + b)
    w, b = critic.params[-1]
    return h @ w + b


if __name__ == "__main__":
    key = jax.random.PRNGKey(0)
    key, kx, kp, kx2, kp1 = jax.random.split(key, 5)

    # Shapes consistent with the Critic module: 3-layer MLP,
    # input_dim=32, hidden_dim=32, output_dim=1 (scalar value head).
    batch, input_dim, hidden_dim, output_dim, num_layers = 8, 32, 32, 1, 3
    critic = CriticPallas(num_layers, input_dim, hidden_dim, output_dim, kp)

    # Case 1: small batch -> single full-batch block, no padding.
    x = jax.random.normal(kx, (batch, input_dim), jnp.float32)
    out = jax.block_until_ready(critic(x))
    ref = _reference_forward(critic, x)
    assert out.shape == (batch, output_dim)
    assert jnp.allclose(out, ref, atol=1e-5, rtol=1e-5), (
        f"max abs err: {jnp.max(jnp.abs(out - ref))}")

    # Case 2: batch > single-block max -> >=2 lane-aligned (multiple-of-128)
    # tiles, minimal padding, "parallel" grid, lane-dense transposed output.
    big_batch = 1300
    x2 = jax.random.normal(kx2, (big_batch, input_dim), jnp.float32)
    out2 = jax.block_until_ready(critic(x2))
    ref2 = _reference_forward(critic, x2)
    assert out2.shape == (big_batch, output_dim)
    assert jnp.allclose(out2, ref2, atol=1e-5, rtol=1e-5), (
        f"max abs err: {jnp.max(jnp.abs(out2 - ref2))}")

    # Case 3: num_layers == 1 (pure linear model path).
    critic_lin = CriticPallas(1, input_dim, hidden_dim, output_dim, kp1)
    out3 = jax.block_until_ready(critic_lin(x))
    ref3 = _reference_forward(critic_lin, x)
    assert out3.shape == (batch, output_dim)
    assert jnp.allclose(out3, ref3, atol=1e-5, rtol=1e-5), (
        f"max abs err: {jnp.max(jnp.abs(out3 - ref3))}")

    print("KERNEL_OK")
</pallas_src>

<mosaic_0001>
module attributes {stable_mosaic.version = 11 : i64} {
  func.func @_fused_mlp_kernel(%arg0: i32, %arg1: memref<8x32xf32, #tpu.memory_space<vmem>>, %arg2: memref<32x32xf32, #tpu.memory_space<vmem>>, %arg3: memref<1x32xf32, #tpu.memory_space<vmem>>, %arg4: memref<32x32xf32, #tpu.memory_space<vmem>>, %arg5: memref<1x32xf32, #tpu.memory_space<vmem>>, %arg6: memref<1x32xf32, #tpu.memory_space<vmem>>, %arg7: memref<1x1xf32, #tpu.memory_space<vmem>>, %arg8: memref<1x8xf32, #tpu.memory_space<vmem>>) attributes {dimension_semantics = [#tpu.dimension_semantics<parallel>], iteration_bounds = array<i64: 1>, scalar_prefetch = 0 : i64, scratch_operands = 0 : i64, tpu.core_type = #tpu.core_type<tc>, window_params = [{transform_indices = @transform_0, window_bounds = array<i64: 8, 32>}, {pipeline_mode = #tpu.pipeline_mode<synchronous>, transform_indices = @transform_1, window_bounds = array<i64: 32, 32>}, {pipeline_mode = #tpu.pipeline_mode<synchronous>, transform_indices = @transform_2, window_bounds = array<i64: 1, 32>}, {pipeline_mode = #tpu.pipeline_mode<synchronous>, transform_indices = @transform_3, window_bounds = array<i64: 32, 32>}, {pipeline_mode = #tpu.pipeline_mode<synchronous>, transform_indices = @transform_4, window_bounds = array<i64: 1, 32>}, {pipeline_mode = #tpu.pipeline_mode<synchronous>, transform_indices = @transform_5, window_bounds = array<i64: 1, 32>}, {pipeline_mode = #tpu.pipeline_mode<synchronous>, transform_indices = @transform_6, window_bounds = array<i64: 1, 1>}, {transform_indices = @transform_7, window_bounds = array<i64: 1, 8>}]} {
    %c0 = arith.constant 0 : index
    %c0_0 = arith.constant 0 : index
    %0 = vector.load %arg1[%c0, %c0_0] : memref<8x32xf32, #tpu.memory_space<vmem>>, vector<8x32xf32>
    %c0_1 = arith.constant 0 : index
    %c0_2 = arith.constant 0 : index
    %1 = vector.load %arg2[%c0_1, %c0_2] : memref<32x32xf32, #tpu.memory_space<vmem>>, vector<32x32xf32>
    %c0_3 = arith.constant 0 : index
    %c0_4 = arith.constant 0 : index
    %2 = vector.load %arg3[%c0_3, %c0_4] : memref<1x32xf32, #tpu.memory_space<vmem>>, vector<1x32xf32>
    %cst = arith.constant dense<0.000000e+00> : vector<8x32xf32>
    %3 = tpu.matmul %0, %1, %cst {dimension_numbers = #tpu.dot_dimension_numbers<[1], [0], [0], [1], [0, 0, 1, 1], [], []>} : vector<8x32xf32>, vector<32x32xf32>, vector<8x32xf32> -> vector<8x32xf32>
    %4 = vector.broadcast %2 : vector<1x32xf32> to vector<8x32xf32>
    %5 = arith.addf %3, %4 : vector<8x32xf32>
    %6 = math.tanh %5 : vector<8x32xf32>
    %c0_5 = arith.constant 0 : index
    %c0_6 = arith.constant 0 : index
    %7 = vector.load %arg4[%c0_5, %c0_6] : memref<32x32xf32, #tpu.memory_space<vmem>>, vector<32x32xf32>
    %c0_7 = arith.constant 0 : index
    %c0_8 = arith.constant 0 : index
    %8 = vector.load %arg5[%c0_7, %c0_8] : memref<1x32xf32, #tpu.memory_space<vmem>>, vector<1x32xf32>
    %cst_9 = arith.constant dense<0.000000e+00> : vector<8x32xf32>
    %9 = tpu.matmul %6, %7, %cst_9 {dimension_numbers = #tpu.dot_dimension_numbers<[1], [0], [0], [1], [0, 0, 1, 1], [], []>} : vector<8x32xf32>, vector<32x32xf32>, vector<8x32xf32> -> vector<8x32xf32>
    %10 = vector.broadcast %8 : vector<1x32xf32> to vector<8x32xf32>
    %11 = arith.addf %9, %10 : vector<8x32xf32>
    %12 = math.tanh %11 : vector<8x32xf32>
    %c0_10 = arith.constant 0 : index
    %c0_11 = arith.constant 0 : index
    %13 = vector.load %arg6[%c0_10, %c0_11] : memref<1x32xf32, #tpu.memory_space<vmem>>, vector<1x32xf32>
    %c0_12 = arith.constant 0 : index
    %c0_13 = arith.constant 0 : index
    %14 = vector.load %arg7[%c0_12, %c0_13] : memref<1x1xf32, #tpu.memory_space<vmem>>, vector<1x1xf32>
    %cst_14 = arith.constant dense<0.000000e+00> : vector<1x8xf32>
    %15 = tpu.matmul %13, %12, %cst_14 {dimension_numbers = #tpu.dot_dimension_numbers<[1], [1], [0], [0], [0, 0, 1, 0], [], []>} : vector<1x32xf32>, vector<8x32xf32>, vector<1x8xf32> -> vector<1x8xf32>
    %16 = vector.broadcast %14 : vector<1x1xf32> to vector<1x8xf32>
    %17 = arith.addf %15, %16 : vector<1x8xf32>
    %c0_15 = arith.constant 0 : index
    %c0_16 = arith.constant 0 : index
    %18 = vector.load %arg8[%c0_15, %c0_16] : memref<1x8xf32, #tpu.memory_space<vmem>>, vector<1x8xf32>
    tpu.vector_store %arg8[%c0_15, %c0_16], %17 {strides = array<i32>} : memref<1x8xf32, #tpu.memory_space<vmem>>, vector<1x8xf32>,
    return
  }
  func.func @transform_0(%arg0: i32) -> (i32, i32) {
    %c0_i32 = arith.constant 0 : i32
    %c0_i32_0 = arith.constant 0 : i32
    return %arg0, %c0_i32 : i32, i32
  }
  func.func @transform_1(%arg0: i32) -> (i32, i32) {
    %c0_i32 = arith.constant 0 : i32
    %c0_i32_0 = arith.constant 0 : i32
    %c0_i32_1 = arith.constant 0 : i32
    return %c0_i32, %c0_i32_0 : i32, i32
  }
  func.func @transform_2(%arg0: i32) -> (i32, i32) {
    %c0_i32 = arith.constant 0 : i32
    %c0_i32_0 = arith.constant 0 : i32
    %c0_i32_1 = arith.constant 0 : i32
    return %c0_i32, %c0_i32_0 : i32, i32
  }
  func.func @transform_3(%arg0: i32) -> (i32, i32) {
    %c0_i32 = arith.constant 0 : i32
    %c0_i32_0 = arith.constant 0 : i32
    %c0_i32_1 = arith.constant 0 : i32
    return %c0_i32, %c0_i32_0 : i32, i32
  }
  func.func @transform_4(%arg0: i32) -> (i32, i32) {
    %c0_i32 = arith.constant 0 : i32
    %c0_i32_0 = arith.constant 0 : i32
    %c0_i32_1 = arith.constant 0 : i32
    return %c0_i32, %c0_i32_0 : i32, i32
  }
  func.func @transform_5(%arg0: i32) -> (i32, i32) {
    %c0_i32 = arith.constant 0 : i32
    %c0_i32_0 = arith.constant 0 : i32
    %c0_i32_1 = arith.constant 0 : i32
    return %c0_i32, %c0_i32_0 : i32, i32
  }
  func.func @transform_6(%arg0: i32) -> (i32, i32) {
    %c0_i32 = arith.constant 0 : i32
    %c0_i32_0 = arith.constant 0 : i32
    %c0_i32_1 = arith.constant 0 : i32
    return %c0_i32, %c0_i32_0 : i32, i32
  }
  func.func @transform_7(%arg0: i32) -> (i32, i32) {
    %c0_i32 = arith.constant 0 : i32
    %c0_i32_0 = arith.constant 0 : i32
    return %c0_i32, %arg0 : i32, i32
  }
}

</mosaic_0001>

<bundles_post_ra>
// kernel: tpu_custom_call.1
= control target key start
LH: loop header
LB: loop body
LE: loop exit
PB: predicated region body
PF: predicated region fallthrough
CT: control target
= control target key end

     0   :  { %s389_s0 = inlined_call_operand.hbm [shape: f32[8,32], index: 0, kind: input, shape index: {}]   ;;  %s390_s1 = inlined_call_operand.hbm [shape: f32[32,32], index: 1, kind: input, shape index: {}]   ;;  %s391_s2 = inlined_call_operand.vmem [shape: f32[1,32], index: 2, kind: input, shape index: {}]   ;;  %s392_s3 = inlined_call_operand.hbm [shape: f32[32,32], index: 3, kind: input, shape index: {}]   ;;  %s393_s4 = inlined_call_operand.vmem [shape: f32[1,32], index: 4, kind: input, shape index: {}]   ;;  %s394_s5 = inlined_call_operand.vmem [shape: f32[1,32], index: 5, kind: input, shape index: {}]   ;;  %s395_s6 = inlined_call_operand.<no memory space> [shape: f32[1,1], index: 6, kind: input, shape index: {}]   ;;  %s396_s7 = inlined_call_operand.hbm [shape: f32[1,8], index: 7, kind: output, shape index: {}]  }
   0x1   :  { %v12_v0 = vstv %s395_s6 }
   0x2   :  { %13 = vst [vmem:[#allocation2] sm:$0x1] %v12_v0 }
   0x3   :  { %14 = vsyncpa [#allocation4], 0 }
   0x4   :  { %15 = vsyncpa [#allocation7], 0  ;;  %s32_s28 = sshll.u32 %s390_s1, 4  ;;  %s33_s28 = int_to_ptr.hbm [resolvable:$true] %s32_s28 }
   0x5   :  { %16 = vsyncpa [#allocation5], 0  ;;  %s314_s29 = smov [#allocation6]   ;;  %s22_s10 = sshll.u32 %s389_s0, 4  ;;  %s23_s10 = int_to_ptr.hbm [resolvable:$true] %s22_s10 }
   0x6   :  { %s34_s30 = sshll.u32 %s314_s29, 4  ;;  %s315_s11 = smov 128   ;;  %s35_s30 = int_to_ptr.vmem [resolvable:$true] %s34_s30 }
   0x7   :  { %s316_s12 = smov 8   ;;  %s317_s6 = smov [#allocation3]  }
   0x8   :  { %40 = dma.hbm_to_vmem [thread:$0]  %s33_s28, 512, %s35_s30, [#allocation7], %s315_s11, %s315_s11, %s316_s12  }
   0x9   :  { %s24_s13 = sshll.u32 %s317_s6, 4  ;;  %s47_s16 = sshll.u32 %s392_s3, 4  ;;  %s25_s13 = int_to_ptr.vmem [resolvable:$true] %s24_s13  ;;  %s48_s16 = int_to_ptr.hbm [resolvable:$true] %s47_s16 }
   0xa   :  { %27 = dma.hbm_to_vmem [thread:$0]  %s23_s10, 128, %s25_s13, [#allocation4]  }
   0xb   :  { %s318_s1 = smov [#allocation8]  }
   0xc   :  { %s49_s17 = sshll.u32 %s318_s1, 4  ;;  %s50_s17 = int_to_ptr.vmem [resolvable:$true] %s49_s17 }
   0xd   :  { %55 = dma.hbm_to_vmem [thread:$0]  %s48_s16, 512, %s50_s17, [#allocation7], %s315_s11, %s315_s11, %s316_s12  }
   0xe   :  { %308 = dma.done.wait [#allocation4], 128  }
   0xf   :  { %309 = vsyncadd [#allocation4], 4294967168 }
  0x10   :  { %310 = dma.done.wait [#allocation7], 1024  }
  0x11   :  { %311 = vsyncadd [#allocation7], 4294966272  ;;  %v78_v1 = vld [vmem:[#allocation6 + $0x18] sm:$0xff]  ;;  %v77_v2 = vld [vmem:[#allocation6 + $0x10] sm:$0xff]  ;;  %vm83_vm0 = vcmask 261120   ;;  %v319_v15 = vmov 0  }
  0x12   :  { %99 = vmatpush.msra.mxu0 %v78_v1  ;;  %v76_v3 = vld [vmem:[#allocation6 + $0x8] sm:$0xff]  ;;  %v75_v4 = vld [vmem:[#allocation6] sm:$0xff]  ;;  %v74_v5 = vld [vmem:[#allocation3] sm:$0xff]  ;;  %205 = vset.pattern.permute.xlu0 %v319_v15  ;;  %s320_s21 = smov [#allocation9]   ;;  %vm174_vm1 = vcmask 57344  }
  0x13   :  { %v111_v6 = vld [vmem:[#allocation8 + $0x18] sm:$0xff]  ;;  %v110_v7 = vld [vmem:[#allocation8 + $0x10] sm:$0xff]  ;;  %v109_v8 = vld [vmem:[#allocation8 + $0x8] sm:$0xff]  ;;  %s181_s22 = sshll.u32 %s320_s21, 4  ;;  %s182_s22 = int_to_ptr.vmem [resolvable:$true] %s181_s22 }
  0x14   :  { %100 = vmatpush.msra.mxu0 %v77_v2  ;;  %131 = vmatpush.msra.mxu1 %v111_v6  ;;  %v108_v9 = vld [vmem:[#allocation8] sm:$0xff]  ;;  %v206_v10 = vld [vmem:[%s391_s2] ss:$0 sm:$0xff] }
  0x15   :  { %v141_v14 = vld [vmem:[#allocation2] sm:$0x1] }
  0x16   :  { %101 = vmatpush.msra.mxu0 %v76_v3  ;;  %132 = vmatpush.msra.mxu1 %v110_v7  ;;  %v207_v16 = vld [vmem:[%s393_s4] ss:$0 sm:$0xff]  ;;  %s183_s4 = sshll.u32 %s396_s7, 4  ;;  %s184_s4 = int_to_ptr.hbm [resolvable:$true] %s183_s4 }
  0x17   :  { %144 = vperm.xlu0 %205, %v141_v14   ;;  %v140_v20 = vld [vmem:[%s394_s5] sm:$0x1] }
  0x18   :  { %102 = vmatpush.msra.mxu0 %v75_v4  ;;  %133 = vmatpush.msra.mxu1 %v109_v8 }
  0x19   :  { %194 = vmatmul.msk.f32.vlgmr.msra.gmra.mxu0 %vm83_vm0, %v74_v5 }
  0x1a   :  { %134 = vmatpush.msra.mxu1 %v108_v9 }
  0x89   :  { %v145_v21 = vpop.permute.xlu0 %144 }
  0x8a   :  { %v147_v22 = vperm.slane %v145_v21, 0 }
  0x96   :  { %v104_v11 = vpop.f32.mrf.mxu0 }
  0x97   :  { %v105_v12 = vadd.f32 %v206_v10, %v104_v11 }
  0x99   :  { %208 = vtanh.f32 %v105_v12 }
  0x9f   :  { %v209_v13 = vpop.eup %208 }
  0xa0   :  { %195 = vmatmul.msk.f32.vlgmr.msra.gmra.mxu1 %vm83_vm0, %v209_v13 }
 0x11d   :  { %v136_v17 = vpop.f32.mrf.mxu1 }
 0x11e   :  { %v137_v18 = vadd.f32 %v207_v16, %v136_v17 }
 0x120   :  { %210 = vtanh.f32 %v137_v18 }
 0x126   :  { %v211_v19 = vpop.eup %210 }
 0x127   :  { %196 = vmatpush.xpose.msk.msra.mxu2 %vm83_vm0, %v211_v19 }
 0x12a   :  { %197 = vmatmul.msk.f32.vlgmr.msra.gmra.mxu2 %vm83_vm0, %v140_v20 }
 0x1ad   :  { %v171_v23 = vpop.f32.mrf.mxu2 }
 0x1ae   :  { %v172_v24 = vadd.f32 %v171_v23, %v147_v22 }
 0x1b0   :  { %175 = vst.msk [vmem:[#allocation9] sm:$0x1] %vm174_vm1, %v172_v24 }
 0x1b1   :  { %186 = dma.vmem_to_hbm [thread:$0]  %s182_s22, 16, %s184_s4, [#allocation5]  }
 0x1b2   :  { %312 = dma.done.wait [#allocation5], 16  }
 0x1b3   :  { %313 = vsyncadd [#allocation5], 4294967280 }
 0x1b4   :  { %191 = vsyncpa [#allocation4], 1 }
 0x1b5   :  { %192 = vsyncpa [#allocation7], 1 }
 0x1b6   :  { %193 = vsyncpa [#allocation5], 1 }

</bundles_post_ra>
